<compile_context>
chip_gen: v7x
topology: tpu7x:2x2x1
jax: 0.10.0
libtpu: 0.0.40
codegen_flags: <defaults>
</compile_context>

<pallas_src>
import functools

import jax
import jax.numpy as jnp
from jax import lax
from jax.experimental import pallas as pl
from jax.experimental.pallas import tpu as pltpu


def _ohkm_mse_kernel(o_ref, t_ref, wsq_ref, out_ref, acc_ref, *,
                     topk, hw_tile, hw_valid, mask_tail):
    """One grid step: accumulate per-keypoint SSE; finalize with OHKM top-k."""
    h = pl.program_id(1)

    @pl.when(h == 0)
    def _init():
        acc_ref[...] = jnp.zeros_like(acc_ref)

    # Hot path: residual, squared, reduced over the lane (HW) axis.
    # (target weights are factored out of the square; applied in the epilogue)
    d = o_ref[...].astype(jnp.float32) - t_ref[...].astype(jnp.float32)
    if mask_tail:
        # Last HW block extends past the true HW; zero the ragged tail
        # (the out-of-bounds part of the VMEM buffer holds unspecified data).
        col = h * hw_tile + lax.broadcasted_iota(jnp.int32, d.shape, 2)
        d = jnp.where(col < hw_valid, d, 0.0)
    acc_ref[...] += jnp.sum(d * d, axis=-1, keepdims=True)   # [b_tile, K, 1]

    @pl.when(h == pl.num_programs(1) - 1)
    def _finalize():
        b_tile, K, _ = acc_ref.shape
        # per-keypoint weighted mean MSE:  sum((o-t)^2) * w^2 / HW
        losses = acc_ref[...] * wsq_ref[...]                  # [b_tile, K, 1]

        # Online hard keypoint mining: per-sample sum of the top-k losses.
        # Statically unrolled (topk is small & fixed): take max, mask out its
        # first occurrence (matches torch.topk's sum under ties).
        row = lax.broadcasted_iota(jnp.int32, (b_tile, K, 1), 1)
        cur = losses
        total = jnp.zeros((b_tile, 1, 1), jnp.float32)
        for _ in range(topk):
            m = jnp.max(cur, axis=1, keepdims=True)           # [b_tile, 1, 1]
            eq = cur == m
            idx = jnp.min(jnp.where(eq, row, K), axis=1, keepdims=True)
            cur = jnp.where(row == idx, -jnp.inf, cur)
            total = total + m

        # Lane-dense store of the per-sample top-k sums.
        out_ref[...] = jnp.broadcast_to(total, out_ref.shape)


def _sublane_pack(itemsize):
    # Sublane packing of the VMEM layout: f32 -> 8, bf16 -> 16, int8 -> 32.
    return (4 // itemsize) * 8


def _device_budgets():
    """(per-input tile budget bytes, vmem_limit cap bytes) by TPU generation."""
    kind = ""
    try:
        kind = jax.devices()[0].device_kind.lower()
    except Exception:
        pass
    if "v5 lite" in kind or "v5e" in kind or "v5lite" in kind:
        return 2 << 20, 96 << 20          # ~820 GB/s; 128 MiB physical VMEM
    if "v6" in kind:
        return 4 << 20, 96 << 20          # ~1.4 TB/s; 128 MiB physical VMEM
    if "v7" in kind:
        return 4 << 20, 48 << 20          # ~3.2 TB/s; only 64 MiB physical VMEM
    return 2 << 20, 48 << 20              # unknown: conservative


def _pick_tiles(B, K, HW, itemsize, tile_budget_bytes):
    """Choose (b_tile, hw_tile): lane-dense tiles, no wrapper padding needed."""
    pack = _sublane_pack(itemsize)
    k_pad_in = pl.cdiv(K, pack) * pack     # sublane-padded K of the input tiles

    # Keep >= 2 steps on the "parallel" batch axis so both v7x cores get work.
    b_cap = 8 if B >= 16 else max(1, B // 2)
    b_tile = 1
    for c in (8, 4, 2, 1):
        if c <= b_cap and B % c == 0:
            b_tile = c
            break
    while b_tile > 1 and b_tile * k_pad_in * 128 * itemsize > tile_budget_bytes:
        b_tile //= 2                       # stays a power-of-two divisor of B

    hw_pad = pl.cdiv(HW, 128) * 128
    max_ht = (tile_budget_bytes // (b_tile * k_pad_in * itemsize)) // 128 * 128
    max_ht = min(hw_pad, max(128, max_ht))

    # Fewest HW grid steps first, then least masked-tail waste (smallest tile).
    best_key, hw_tile = None, 128
    for ht in range(128, max_ht + 1, 128):
        n = pl.cdiv(HW, ht)
        key = (n, n * ht - HW)
        if best_key is None or key < best_key:
            best_key, hw_tile = key, ht
    return b_tile, hw_tile


def _vmem_bytes_needed(b_tile, K, hw_tile, itemsize):
    """Conservative VMEM budget incl. double-buffering and f32 temporaries."""
    pack = _sublane_pack(itemsize)
    k_in = pl.cdiv(K, pack) * pack
    k_f32 = pl.cdiv(K, 8) * 8
    inputs = 2 * 2 * b_tile * k_in * hw_tile * itemsize   # 2 heatmaps x 2 buffers
    temps = 2 * b_tile * k_f32 * hw_tile * 4              # f32 d / d*d intermediates
    small = (3 * b_tile * k_f32 * 128 + 2 * b_tile * 8 * 128) * 4  # wsq, acc, out
    return inputs + temps + small


def keypoint_ohkm_mse_loss(output, target, target_weights=None, *,
                           use_target_weight=False, topk=8, loss_weight=1.0):
    """JAX/Pallas equivalent of mmpose KeypointOHKMMSELoss.forward."""
    B, K, H, W = output.shape
    if K < topk:
        raise ValueError(
            f"topk ({topk}) should not be larger than num_keypoints ({K}).")
    HW = H * W

    # Free reshapes — heatmaps stay in their native dtype (bf16 stays bf16).
    out2 = output.reshape(B, K, HW)
    tgt2 = target.reshape(B, K, HW)

    if use_target_weight:
        w = target_weights.astype(jnp.float32)
    else:
        w = jnp.ones((B, K), jnp.float32)
    # w^2 / HW, applied once per (b, k) in the kernel epilogue.
    wsq = (w * w * (1.0 / HW)).reshape(B, K, 1)

    itemsize = jnp.dtype(output.dtype).itemsize
    tile_budget, vmem_cap = _device_budgets()
    b_tile, hw_tile = _pick_tiles(B, K, HW, itemsize, tile_budget)
    n_b = B // b_tile
    n_hw = pl.cdiv(HW, hw_tile)
    vmem_limit = int(min(vmem_cap,
                         max(32 << 20,
                             _vmem_bytes_needed(b_tile, K, hw_tile, itemsize)
                             + (4 << 20))))

    kern = functools.partial(
        _ohkm_mse_kernel, topk=int(topk), hw_tile=hw_tile, hw_valid=HW,
        mask_tail=(HW % hw_tile) != 0)

    cost = pl.CostEstimate(
        flops=3 * B * K * HW,
        transcendentals=0,
        bytes_accessed=2 * B * K * HW * itemsize + B * K * 4 + B * 128 * 4)

    per_sample = pl.pallas_call(
        kern,
        out_shape=jax.ShapeDtypeStruct((B, 1, 128), jnp.float32),
        grid=(n_b, n_hw),
        in_specs=[
            pl.BlockSpec((b_tile, K, hw_tile), lambda b, h: (b, 0, h)),
            pl.BlockSpec((b_tile, K, hw_tile), lambda b, h: (b, 0, h)),
            pl.BlockSpec((b_tile, K, 1), lambda b, h: (b, 0, 0)),
        ],
        out_specs=pl.BlockSpec((b_tile, 1, 128), lambda b, h: (b, 0, 0)),
        scratch_shapes=[pltpu.VMEM((b_tile, K, 1), jnp.float32)],
        compiler_params=pltpu.CompilerParams(
            dimension_semantics=("parallel", "arbitrary"),
            vmem_limit_bytes=vmem_limit),
        cost_estimate=cost,
    )(out2, tgt2, wsq)

    topk_sums = per_sample[:, 0, 0]                           # [B]
    # mean over batch of (topk_sum / topk), scaled by loss_weight.
    return jnp.sum(topk_sums) * (float(loss_weight) / (topk * B))


def _reference(output, target, target_weights, *, use_target_weight, topk,
               loss_weight):
    """Pure-JAX reference mirroring the PyTorch module (computed in f32)."""
    output = output.astype(jnp.float32)
    target = target.astype(jnp.float32)
    if use_target_weight:
        w = target_weights.astype(jnp.float32)[:, :, None, None]
        diff = output * w - target * w
    else:
        diff = output - target
    losses = jnp.mean(diff * diff, axis=(2, 3))               # [B, K]
    tk, _ = lax.top_k(losses, topk)
    ohkm = jnp.mean(jnp.sum(tk, axis=1) / topk)
    return ohkm * loss_weight


if __name__ == "__main__":
    key = jax.random.PRNGKey(0)

    # --- Test A: f32, 128-aligned HW, weighted ------------------------------
    B, K, H, W = 2, 16, 16, 16
    topk = 8
    k1, k2, k3, k4, k5 = jax.random.split(key, 5)
    output = jax.random.normal(k1, (B, K, H, W), dtype=jnp.float32)
    target = jax.random.normal(k2, (B, K, H, W), dtype=jnp.float32)
    target_weights = jax.random.uniform(k3, (B, K), dtype=jnp.float32)

    loss = keypoint_ohkm_mse_loss(
        output, target, target_weights,
        use_target_weight=True, topk=topk, loss_weight=1.0)
    loss = jax.block_until_ready(loss)
    ref = _reference(output, target, target_weights,
                     use_target_weight=True, topk=topk, loss_weight=1.0)
    assert jnp.allclose(loss, ref, rtol=1e-5, atol=1e-7), (loss, ref)

    # --- Test B: bf16, non-128-aligned HW (exercises the tail mask) ---------
    B2, K2, H2, W2 = 2, 16, 9, 13         # HW = 117, not a multiple of 128
    topk2 = 5
    out_b = jax.random.normal(k4, (B2, K2, H2, W2), dtype=jnp.float32)
    tgt_b = jax.random.normal(k5, (B2, K2, H2, W2), dtype=jnp.float32)
    out_bf16 = out_b.astype(jnp.bfloat16)
    tgt_bf16 = tgt_b.astype(jnp.bfloat16)

    loss_b = keypoint_ohkm_mse_loss(
        out_bf16, tgt_bf16, None,
        use_target_weight=False, topk=topk2, loss_weight=0.5)
    loss_b = jax.block_until_ready(loss_b)
    ref_b = _reference(out_bf16, tgt_bf16, None,
                       use_target_weight=False, topk=topk2, loss_weight=0.5)
    assert jnp.allclose(loss_b, ref_b, rtol=1e-4, atol=1e-6), (loss_b, ref_b)

    print("KERNEL_OK")
</pallas_src>

<mosaic_0001>
module attributes {stable_mosaic.version = 11 : i64} {
  func.func @_ohkm_mse_kernel(%arg0: i32, %arg1: i32, %arg2: memref<1x16x256xf32, #tpu.memory_space<vmem>>, %arg3: memref<1x16x256xf32, #tpu.memory_space<vmem>>, %arg4: memref<1x16x1xf32, #tpu.memory_space<vmem>>, %arg5: memref<1x1x128xf32, #tpu.memory_space<vmem>>, %arg6: memref<1x16x1xf32, #tpu.memory_space<vmem>>) attributes {dimension_semantics = [#tpu.dimension_semantics<parallel>, #tpu.dimension_semantics<arbitrary>], iteration_bounds = array<i64: 2, 1>, scalar_prefetch = 0 : i64, scratch_operands = 1 : i64, tpu.core_type = #tpu.core_type<tc>, window_params = [{transform_indices = @transform_0, window_bounds = array<i64: 1, 16, 256>}, {transform_indices = @transform_1, window_bounds = array<i64: 1, 16, 256>}, {transform_indices = @transform_2, window_bounds = array<i64: 1, 16, 1>}, {transform_indices = @transform_3, window_bounds = array<i64: 1, 1, 128>}]} {
    %c0_i32 = arith.constant 0 : i32
    %0 = arith.cmpi eq, %arg1, %c0_i32 : i32
    %1 = arith.extui %0 : i1 to i32
    %c0_i32_0 = arith.constant 0 : i32
    %2 = arith.cmpi ne, %1, %c0_i32_0 : i32
    scf.if %2 {
      %cst_14 = arith.constant 0.000000e+00 : f32
      %15 = vector.broadcast %cst_14 : f32 to vector<1x16x1xf32>
      %c0_15 = arith.constant 0 : index
      %c0_16 = arith.constant 0 : index
      %c0_17 = arith.constant 0 : index
      %16 = vector.load %arg6[%c0_15, %c0_16, %c0_17] : memref<1x16x1xf32, #tpu.memory_space<vmem>>, vector<1x16x1xf32>
      tpu.vector_store %arg6[%c0_15, %c0_16, %c0_17], %15 {strides = array<i32>} : memref<1x16x1xf32, #tpu.memory_space<vmem>>, vector<1x16x1xf32>,
    } else {
    }
    %c0 = arith.constant 0 : index
    %c0_1 = arith.constant 0 : index
    %c0_2 = arith.constant 0 : index
    %3 = vector.load %arg2[%c0, %c0_1, %c0_2] : memref<1x16x256xf32, #tpu.memory_space<vmem>>, vector<1x16x256xf32>
    %c0_3 = arith.constant 0 : index
    %c0_4 = arith.constant 0 : index
    %c0_5 = arith.constant 0 : index
    %4 = vector.load %arg3[%c0_3, %c0_4, %c0_5] : memref<1x16x256xf32, #tpu.memory_space<vmem>>, vector<1x16x256xf32>
    %5 = arith.subf %3, %4 : vector<1x16x256xf32>
    %c0_6 = arith.constant 0 : index
    %c0_7 = arith.constant 0 : index
    %c0_8 = arith.constant 0 : index
    %6 = vector.load %arg6[%c0_6, %c0_7, %c0_8] : memref<1x16x1xf32, #tpu.memory_space<vmem>>, vector<1x16x1xf32>
    %7 = arith.mulf %5, %5 : vector<1x16x256xf32>
    %cst = arith.constant dense<0.000000e+00> : vector<1x16xf32>
    %8 = vector.multi_reduction <add>, %7, %cst [2] : vector<1x16x256xf32> to vector<1x16xf32>
    %9 = vector.shape_cast %8 : vector<1x16xf32> to vector<1x16x1xf32>
    %10 = arith.addf %6, %9 : vector<1x16x1xf32>
    %c0_9 = arith.constant 0 : index
    %c0_10 = arith.constant 0 : index
    %c0_11 = arith.constant 0 : index
    %11 = vector.load %arg6[%c0_9, %c0_10, %c0_11] : memref<1x16x1xf32, #tpu.memory_space<vmem>>, vector<1x16x1xf32>
    tpu.vector_store %arg6[%c0_9, %c0_10, %c0_11], %10 {strides = array<i32>} : memref<1x16x1xf32, #tpu.memory_space<vmem>>, vector<1x16x1xf32>,
    %c0_i32_12 = arith.constant 0 : i32
    %12 = arith.cmpi eq, %arg1, %c0_i32_12 : i32
    %13 = arith.extui %12 : i1 to i32
    %c0_i32_13 = arith.constant 0 : i32
    %14 = arith.cmpi ne, %13, %c0_i32_13 : i32
    scf.if %14 {
      %c0_14 = arith.constant 0 : index
      %c0_15 = arith.constant 0 : index
      %c0_16 = arith.constant 0 : index
      %15 = vector.load %arg6[%c0_14, %c0_15, %c0_16] : memref<1x16x1xf32, #tpu.memory_space<vmem>>, vector<1x16x1xf32>
      %c0_17 = arith.constant 0 : index
      %c0_18 = arith.constant 0 : index
      %c0_19 = arith.constant 0 : index
      %16 = vector.load %arg4[%c0_17, %c0_18, %c0_19] : memref<1x16x1xf32, #tpu.memory_space<vmem>>, vector<1x16x1xf32>
      %17 = arith.mulf %15, %16 : vector<1x16x1xf32>
      %18 = tpu.iota {dimensions = array<i32: 1>} : vector<1x16x1xi32>
      %cst_20 = arith.constant 0.000000e+00 : f32
      %19 = vector.broadcast %cst_20 : f32 to vector<1x1x1xf32>
      %cst_21 = arith.constant dense<0xFF800000> : vector<1x1xf32>
      %20 = vector.multi_reduction <maximumf>, %17, %cst_21 [1] : vector<1x16x1xf32> to vector<1x1xf32>
      %21 = vector.shape_cast %20 : vector<1x1xf32> to vector<1x1x1xf32>
      %22 = vector.broadcast %21 : vector<1x1x1xf32> to vector<1x16x1xf32>
      %23 = arith.cmpf oeq, %17, %22 : vector<1x16x1xf32>
      %c16_i32 = arith.constant 16 : i32
      %24 = vector.broadcast %c16_i32 : i32 to vector<1x16x1xi32>
      %25 = arith.select %23, %18, %24 : vector<1x16x1xi1>, vector<1x16x1xi32>
      %cst_22 = arith.constant dense<2147483647> : vector<1x1xi32>
      %26 = vector.multi_reduction <minsi>, %25, %cst_22 [1] : vector<1x16x1xi32> to vector<1x1xi32>
      %27 = vector.shape_cast %26 : vector<1x1xi32> to vector<1x1x1xi32>
      %28 = vector.broadcast %27 : vector<1x1x1xi32> to vector<1x16x1xi32>
      %29 = arith.cmpi eq, %18, %28 : vector<1x16x1xi32>
      %cst_23 = arith.constant 0xFF800000 : f32
      %30 = vector.broadcast %cst_23 : f32 to vector<1x16x1xf32>
      %31 = arith.select %29, %30, %17 : vector<1x16x1xi1>, vector<1x16x1xf32>
      %32 = arith.addf %19, %21 : vector<1x1x1xf32>
      %cst_24 = arith.constant dense<0xFF800000> : vector<1x1xf32>
      %33 = vector.multi_reduction <maximumf>, %31, %cst_24 [1] : vector<1x16x1xf32> to vector<1x1xf32>
      %34 = vector.shape_cast %33 : vector<1x1xf32> to vector<1x1x1xf32>
      %35 = vector.broadcast %34 : vector<1x1x1xf32> to vector<1x16x1xf32>
      %36 = arith.cmpf oeq, %31, %35 : vector<1x16x1xf32>
      %c16_i32_25 = arith.constant 16 : i32
      %37 = vector.broadcast %c16_i32_25 : i32 to vector<1x16x1xi32>
      %38 = arith.select %36, %18, %37 : vector<1x16x1xi1>, vector<1x16x1xi32>
      %cst_26 = arith.constant dense<2147483647> : vector<1x1xi32>
      %39 = vector.multi_reduction <minsi>, %38, %cst_26 [1] : vector<1x16x1xi32> to vector<1x1xi32>
      %40 = vector.shape_cast %39 : vector<1x1xi32> to vector<1x1x1xi32>
      %41 = vector.broadcast %40 : vector<1x1x1xi32> to vector<1x16x1xi32>
      %42 = arith.cmpi eq, %18, %41 : vector<1x16x1xi32>
      %cst_27 = arith.constant 0xFF800000 : f32
      %43 = vector.broadcast %cst_27 : f32 to vector<1x16x1xf32>
      %44 = arith.select %42, %43, %31 : vector<1x16x1xi1>, vector<1x16x1xf32>
      %45 = arith.addf %32, %34 : vector<1x1x1xf32>
      %cst_28 = arith.constant dense<0xFF800000> : vector<1x1xf32>
      %46 = vector.multi_reduction <maximumf>, %44, %cst_28 [1] : vector<1x16x1xf32> to vector<1x1xf32>
      %47 = vector.shape_cast %46 : vector<1x1xf32> to vector<1x1x1xf32>
      %48 = vector.broadcast %47 : vector<1x1x1xf32> to vector<1x16x1xf32>
      %49 = arith.cmpf oeq, %44, %48 : vector<1x16x1xf32>
      %c16_i32_29 = arith.constant 16 : i32
      %50 = vector.broadcast %c16_i32_29 : i32 to vector<1x16x1xi32>
      %51 = arith.select %49, %18, %50 : vector<1x16x1xi1>, vector<1x16x1xi32>
      %cst_30 = arith.constant dense<2147483647> : vector<1x1xi32>
      %52 = vector.multi_reduction <minsi>, %51, %cst_30 [1] : vector<1x16x1xi32> to vector<1x1xi32>
      %53 = vector.shape_cast %52 : vector<1x1xi32> to vector<1x1x1xi32>
      %54 = vector.broadcast %53 : vector<1x1x1xi32> to vector<1x16x1xi32>
      %55 = arith.cmpi eq, %18, %54 : vector<1x16x1xi32>
      %cst_31 = arith.constant 0xFF800000 : f32
      %56 = vector.broadcast %cst_31 : f32 to vector<1x16x1xf32>
      %57 = arith.select %55, %56, %44 : vector<1x16x1xi1>, vector<1x16x1xf32>
      %58 = arith.addf %45, %47 : vector<1x1x1xf32>
      %cst_32 = arith.constant dense<0xFF800000> : vector<1x1xf32>
      %59 = vector.multi_reduction <maximumf>, %57, %cst_32 [1] : vector<1x16x1xf32> to vector<1x1xf32>
      %60 = vector.shape_cast %59 : vector<1x1xf32> to vector<1x1x1xf32>
      %61 = vector.broadcast %60 : vector<1x1x1xf32> to vector<1x16x1xf32>
      %62 = arith.cmpf oeq, %57, %61 : vector<1x16x1xf32>
      %c16_i32_33 = arith.constant 16 : i32
      %63 = vector.broadcast %c16_i32_33 : i32 to vector<1x16x1xi32>
      %64 = arith.select %62, %18, %63 : vector<1x16x1xi1>, vector<1x16x1xi32>
      %cst_34 = arith.constant dense<2147483647> : vector<1x1xi32>
      %65 = vector.multi_reduction <minsi>, %64, %cst_34 [1] : vector<1x16x1xi32> to vector<1x1xi32>
      %66 = vector.shape_cast %65 : vector<1x1xi32> to vector<1x1x1xi32>
      %67 = vector.broadcast %66 : vector<1x1x1xi32> to vector<1x16x1xi32>
      %68 = arith.cmpi eq, %18, %67 : vector<1x16x1xi32>
      %cst_35 = arith.constant 0xFF800000 : f32
      %69 = vector.broadcast %cst_35 : f32 to vector<1x16x1xf32>
      %70 = arith.select %68, %69, %57 : vector<1x16x1xi1>, vector<1x16x1xf32>
      %71 = arith.addf %58, %60 : vector<1x1x1xf32>
      %cst_36 = arith.constant dense<0xFF800000> : vector<1x1xf32>
      %72 = vector.multi_reduction <maximumf>, %70, %cst_36 [1] : vector<1x16x1xf32> to vector<1x1xf32>
      %73 = vector.shape_cast %72 : vector<1x1xf32> to vector<1x1x1xf32>
      %74 = vector.broadcast %73 : vector<1x1x1xf32> to vector<1x16x1xf32>
      %75 = arith.cmpf oeq, %70, %74 : vector<1x16x1xf32>
      %c16_i32_37 = arith.constant 16 : i32
      %76 = vector.broadcast %c16_i32_37 : i32 to vector<1x16x1xi32>
      %77 = arith.select %75, %18, %76 : vector<1x16x1xi1>, vector<1x16x1xi32>
      %cst_38 = arith.constant dense<2147483647> : vector<1x1xi32>
      %78 = vector.multi_reduction <minsi>, %77, %cst_38 [1] : vector<1x16x1xi32> to vector<1x1xi32>
      %79 = vector.shape_cast %78 : vector<1x1xi32> to vector<1x1x1xi32>
      %80 = vector.broadcast %79 : vector<1x1x1xi32> to vector<1x16x1xi32>
      %81 = arith.cmpi eq, %18, %80 : vector<1x16x1xi32>
      %cst_39 = arith.constant 0xFF800000 : f32
      %82 = vector.broadcast %cst_39 : f32 to vector<1x16x1xf32>
      %83 = arith.select %81, %82, %70 : vector<1x16x1xi1>, vector<1x16x1xf32>
      %84 = arith.addf %71, %73 : vector<1x1x1xf32>
      %cst_40 = arith.constant dense<0xFF800000> : vector<1x1xf32>
      %85 = vector.multi_reduction <maximumf>, %83, %cst_40 [1] : vector<1x16x1xf32> to vector<1x1xf32>
      %86 = vector.shape_cast %85 : vector<1x1xf32> to vector<1x1x1xf32>
      %87 = vector.broadcast %86 : vector<1x1x1xf32> to vector<1x16x1xf32>
      %88 = arith.cmpf oeq, %83, %87 : vector<1x16x1xf32>
      %c16_i32_41 = arith.constant 16 : i32
      %89 = vector.broadcast %c16_i32_41 : i32 to vector<1x16x1xi32>
      %90 = arith.select %88, %18, %89 : vector<1x16x1xi1>, vector<1x16x1xi32>
      %cst_42 = arith.constant dense<2147483647> : vector<1x1xi32>
      %91 = vector.multi_reduction <minsi>, %90, %cst_42 [1] : vector<1x16x1xi32> to vector<1x1xi32>
      %92 = vector.shape_cast %91 : vector<1x1xi32> to vector<1x1x1xi32>
      %93 = vector.broadcast %92 : vector<1x1x1xi32> to vector<1x16x1xi32>
      %94 = arith.cmpi eq, %18, %93 : vector<1x16x1xi32>
      %cst_43 = arith.constant 0xFF800000 : f32
      %95 = vector.broadcast %cst_43 : f32 to vector<1x16x1xf32>
      %96 = arith.select %94, %95, %83 : vector<1x16x1xi1>, vector<1x16x1xf32>
      %97 = arith.addf %84, %86 : vector<1x1x1xf32>
      %cst_44 = arith.constant dense<0xFF800000> : vector<1x1xf32>
      %98 = vector.multi_reduction <maximumf>, %96, %cst_44 [1] : vector<1x16x1xf32> to vector<1x1xf32>
      %99 = vector.shape_cast %98 : vector<1x1xf32> to vector<1x1x1xf32>
      %100 = vector.broadcast %99 : vector<1x1x1xf32> to vector<1x16x1xf32>
      %101 = arith.cmpf oeq, %96, %100 : vector<1x16x1xf32>
      %c16_i32_45 = arith.constant 16 : i32
      %102 = vector.broadcast %c16_i32_45 : i32 to vector<1x16x1xi32>
      %103 = arith.select %101, %18, %102 : vector<1x16x1xi1>, vector<1x16x1xi32>
      %cst_46 = arith.constant dense<2147483647> : vector<1x1xi32>
      %104 = vector.multi_reduction <minsi>, %103, %cst_46 [1] : vector<1x16x1xi32> to vector<1x1xi32>
      %105 = vector.shape_cast %104 : vector<1x1xi32> to vector<1x1x1xi32>
      %106 = vector.broadcast %105 : vector<1x1x1xi32> to vector<1x16x1xi32>
      %107 = arith.cmpi eq, %18, %106 : vector<1x16x1xi32>
      %cst_47 = arith.constant 0xFF800000 : f32
      %108 = vector.broadcast %cst_47 : f32 to vector<1x16x1xf32>
      %109 = arith.select %107, %108, %96 : vector<1x16x1xi1>, vector<1x16x1xf32>
      %110 = arith.addf %97, %99 : vector<1x1x1xf32>
      %cst_48 = arith.constant dense<0xFF800000> : vector<1x1xf32>
      %111 = vector.multi_reduction <maximumf>, %109, %cst_48 [1] : vector<1x16x1xf32> to vector<1x1xf32>
      %112 = vector.shape_cast %111 : vector<1x1xf32> to vector<1x1x1xf32>
      %113 = arith.addf %110, %112 : vector<1x1x1xf32>
      %114 = vector.shape_cast %113 : vector<1x1x1xf32> to vector<1x1x1xf32>
      %115 = vector.broadcast %114 : vector<1x1x1xf32> to vector<1x1x128xf32>
      %c0_49 = arith.constant 0 : index
      %c0_50 = arith.constant 0 : index
      %c0_51 = arith.constant 0 : index
      %116 = vector.load %arg5[%c0_49, %c0_50, %c0_51] : memref<1x1x128xf32, #tpu.memory_space<vmem>>, vector<1x1x128xf32>
      tpu.vector_store %arg5[%c0_49, %c0_50, %c0_51], %115 {strides = array<i32>} : memref<1x1x128xf32, #tpu.memory_space<vmem>>, vector<1x1x128xf32>,
    } else {
    }
    return
  }
  func.func @transform_0(%arg0: i32, %arg1: i32) -> (i32, i32, i32) {
    %c0_i32 = arith.constant 0 : i32
    %c0_i32_0 = arith.constant 0 : i32
    return %arg0, %c0_i32, %arg1 : i32, i32, i32
  }
  func.func @transform_1(%arg0: i32, %arg1: i32) -> (i32, i32, i32) {
    %c0_i32 = arith.constant 0 : i32
    %c0_i32_0 = arith.constant 0 : i32
    return %arg0, %c0_i32, %arg1 : i32, i32, i32
  }
  func.func @transform_2(%arg0: i32, %arg1: i32) -> (i32, i32, i32) {
    %c0_i32 = arith.constant 0 : i32
    %c0_i32_0 = arith.constant 0 : i32
    %c0_i32_1 = arith.constant 0 : i32
    return %arg0, %c0_i32, %c0_i32_0 : i32, i32, i32
  }
  func.func @transform_3(%arg0: i32, %arg1: i32) -> (i32, i32, i32) {
    %c0_i32 = arith.constant 0 : i32
    %c0_i32_0 = arith.constant 0 : i32
    %c0_i32_1 = arith.constant 0 : i32
    return %arg0, %c0_i32, %c0_i32_0 : i32, i32, i32
  }
}

</mosaic_0001>

<bundles_post_ra>
// kernel: tpu_custom_call.1
= control target key start
LH: loop header
LB: loop body
LE: loop exit
PB: predicated region body
PF: predicated region fallthrough
CT: control target
= control target key end

     0   :  { %8 = vsyncpa [#allocation4], 0  ;;  %s1255_s0 = inlined_call_operand.hbm [shape: f32[2,16,256], index: 0, kind: input, shape index: {}]   ;;  %s1256_s1 = inlined_call_operand.hbm [shape: f32[2,16,256], index: 1, kind: input, shape index: {}]   ;;  %s1257_s2 = inlined_call_operand.vmem [shape: f32[2,16,1], index: 2, kind: input, shape index: {}]   ;;  %s1258_s3 = inlined_call_operand.hbm [shape: f32[2,1,128], index: 3, kind: output, shape index: {}]  }
   0x1   :  { %10 = vsyncpa [#allocation4 + $0x1], 0 }
   0x2   :  { %11 = vsyncpa [#allocation7], 0 }
   0x3   :  { %13 = vsyncpa [#allocation7 + $0x1], 0 }
   0x4   :  { %14 = vsyncpa [#allocation5], 0 }
   0x5   :  { %16 = vsyncpa [#allocation5 + $0x1], 0  ;;  %s948_s12 = smov 0   ;;  %s950_s13 = smov 0  }
   0x6   :  { %s952_s14 = smov 0   ;;  %s954_s15 = smov 0  }
   0x7   :  { %s956_s16 = smov 0   ;;  %s958_s17 = smov 0  }
   0x8 LB: > { %s679_s18 = sadd.s32 4294967295, %s919_s17   ;;  %s680_s19 = sadd.s32 4294967294, %s919_s17   ;;  %s919_s17 = sphi %s958_s17, %s22_s17   ;;  %s915_s16 = sphi %s956_s16, %s1276_s16   ;;  %s911_s15 = sphi %s954_s15, %s1275_s15   ;;  %s907_s14 = sphi %s952_s14, %s1274_s14   ;;  %s903_s13 = sphi %s950_s13, %s1273_s13   ;;  %s899_s12 = sphi %s948_s12, %s1272_s12  }
   0x9   : > { %s34_s20 = sadd.s32 1, %s915_s16  ;;  %s43_s21 = sadd.s32 1, %s907_s14 }
   0xa   : > { %p36_p0 = scmp.ge.s32.totalorder %s34_s20, 2  ;;  %p50_p1 = scmp.ne.s32.totalorder %s907_s14, %s903_s13 }
   0xb   : > { %p51_p2 = scmp.eq.s32.totalorder %s919_s17, 0  ;;  %p56_p3 = scmp.ne.s32.totalorder %s903_s13, %s899_s12 }
   0xc   : > { %s1278_s20 = smov (%p36_p0, %s34_s20), 0  ;;  %p57_p5 = scmp.eq.s32.totalorder %s679_s18, 0 }
   0xd   : > { %p989_p4 = por %p51_p2, %p50_p1  ;;  %s38_s23 = ssub.s32 %s915_s16, %s1278_s20 }
   0xe   : > { %p134_p6 = scmp.eq.s32.totalorder %s679_s18, 1  ;;  %p41_p7 = scmp.eq.s32.totalorder %s38_s23, 0 }
   0xf   : > { %p995_p8 = por %p57_p5, %p56_p3  ;;  %p140_p10 = scmp.eq.s32.totalorder %s680_s19, 1 }
  0x10   : > { %p999_p9 = por %p134_p6, %p50_p1  ;;  %p717_p13 = scmp.lt.s32.totalorder %s919_s17, 2 }
  0x11   : > { %s1262_s24 = scalar_select %p995_p8, 1, 0 }
  0x12   : > { %s1263_s25 = scalar_select %p999_p9, 1, 0 }
  0x13   : > { %s1004_s26 = scalar_select %p41_p7, %s907_s14, %s43_s21  }
  0x14   : > { %p1006_p11 = por %p140_p10, %p56_p3  ;;  %s1013_s28 = sand.u32 1, %s907_s14  }
  0x15   : > { %s683_s29 = sshll.u32 %s1013_s28, 5  ;;  %s697_s30 = sshll.u32 %s915_s16, 9 }
  0x16   : > { %s1264_s27 = scalar_select %p1006_p11, 1, 0 }
  0x17   : > { %s1022_s6 = scalar_lea.hbm %s1255_s0, %s697_s30  ;;  %s164_s7 = scalar_lea.vmem [#allocation3], %s683_s29 }
  0x18   : > { %s173_s8 = sshll.u32 %s164_s7, 4  ;;  %p1030_p0 = pnand %p717_p13, %p989_p4  ;;  %s1026_s8 = int_to_ptr.vmem [resolvable:$true] %s173_s8 }
  0x19   : > { %s161_s10 = scalar_lea.sflag [#allocation4], %s1013_s28  ;;  %s773_s11 = scalar_lea.hbm %s1022_s6, 512 }
  0x1a   : > { %p774_p2 = scmp.ne.s32.totalorder %s1022_s6, %s773_s11  ;;  %p775_p3 = pneg %p1030_p0 }
  0x1b   : > { %s778_s21 = scalar_lea.hbm %s1255_s0, 1024  ;;  %p779_p4 = scmp.lt.u32.totalorder %s1022_s6, %s1255_s0 }
  0x1c   : > { %p776_p5 = pnand %p775_p3, %p774_p2  ;;  %p780_p7 = scmp.lt.u32.totalorder %s778_s21, %s773_s11 }
  0x1d   : > { %p782_p13 = scmp.lt.u32.totalorder %s773_s11, %s1022_s6 }
  0x1e   : > { %p777_p6 = pneg %p776_p5  ;;  %p781_p10 = por %p780_p7, %p779_p4 }
  0x20   : > { %p783_p12 = por %p782_p13, %p781_p10 }
  0x22   : > { %p784_p1 = pnand %p783_p12, %p777_p6 }
  0x24   : > { %787 = shalt.err (!%p784_p1)
}
  0x25   : > { %s788_s4 = scalar_lea.vmem %s1026_s8, 512  ;;  %s921_s5 = smov [#allocation3]  }
  0x26   : > { %p789_p2 = scmp.ne.s32.totalorder %s1026_s8, %s788_s4  ;;  %s793_s7 = sshll.u32 %s921_s5, 4  ;;  %s794_s7 = int_to_ptr.vmem [resolvable:$false] %s793_s7 }
  0x27   : > { %s795_s18 = scalar_lea.vmem %s794_s7, 1024  ;;  %p796_p9 = scmp.lt.s32.totalorder %s1026_s8, %s794_s7 }
  0x28   : > { %p791_p5 = pnand %p789_p2, %p775_p3  ;;  %p797_p4 = scmp.lt.s32.totalorder %s795_s18, %s788_s4 }
  0x2a   : > { %p792_p11 = pneg %p791_p5  ;;  %p798_p7 = por %p797_p4, %p796_p9 }
  0x2c   : > { %p799_p10 = pnand %p798_p7, %p792_p11 }
  0x2e   : > { %802 = shalt.err (!%p799_p10)
}
  0x2f   : > { %s922_s11 = smov 256   ;;  %s923_s19 = smov 16  }
  0x30   : > { %709 = dma.hbm_to_vmem [thread:$0]  (!%p1030_p0), %s1022_s6, 512, %s1026_s8, %s161_s10, %s922_s11, %s922_s11, %s923_s19  }
  0x31   : > { %p212_p9 = scmp.lt.s32.totalorder %s919_s17, 3  ;;  %s1072_s23 = scalar_lea.hbm %s1256_s1, %s697_s30 }
  0x32   : > { %p1266_p11 = scmp.ge.s32.totalorder %s919_s17, 1  ;;  %s187_s5 = scalar_lea.vmem [#allocation6], %s683_s29 }
  0x33   : > { %s196_s7 = sshll.u32 %s187_s5, 4  ;;  %s184_s6 = scalar_lea.sflag [#allocation7], %s1013_s28  ;;  %s1082_s7 = int_to_ptr.vmem [resolvable:$true] %s196_s7 }
  0x34   : > { %p1076_p12 = pnand %p1266_p11, %p212_p9  ;;  %s803_s8 = scalar_lea.hbm %s1072_s23, 512 }
  0x35   : > { %p804_p1 = scmp.ne.s32.totalorder %s1072_s23, %s803_s8  ;;  %s808_s18 = scalar_lea.hbm %s1256_s1, 1024 }
  0x36   : > { %p809_p2 = scmp.lt.u32.totalorder %s1072_s23, %s1256_s1  ;;  %p810_p5 = scmp.lt.u32.totalorder %s808_s18, %s803_s8 }
  0x37   : > { %p806_p6 = pnand %p804_p1, %p775_p3  ;;  %p812_p7 = scmp.lt.u32.totalorder %s803_s8, %s1072_s23 }
  0x38   : > { %p811_p4 = por %p810_p5, %p809_p2 }
  0x39   : > { %p807_p13 = pneg %p806_p6 }
  0x3a   : > { %p813_p10 = por %p812_p7, %p811_p4 }
  0x3c   : > { %p814_p9 = pnand %p813_p10, %p807_p13 }
  0x3e   : > { %817 = shalt.err (!%p814_p9)
}
  0x3f   : > { %s818_s29 = scalar_lea.vmem %s1082_s7, 512  ;;  %s924_s5 = smov [#allocation6]  }
  0x40   : > { %p819_p11 = scmp.ne.s32.totalorder %s1082_s7, %s818_s29  ;;  %s823_s30 = sshll.u32 %s924_s5, 4  ;;  %s824_s30 = int_to_ptr.vmem [resolvable:$false] %s823_s30 }
  0x41   : > { %s825_s10 = scalar_lea.vmem %s824_s30, 1024  ;;  %p826_p8 = scmp.lt.s32.totalorder %s1082_s7, %s824_s30 }
  0x42   : > { %p821_p1 = pnand %p819_p11, %p775_p3  ;;  %p827_p2 = scmp.lt.s32.totalorder %s825_s10, %s818_s29 }
  0x44   : > { %p822_p6 = pneg %p821_p1  ;;  %p828_p5 = por %p827_p2, %p826_p8 }
  0x46   : > { %p829_p4 = pnand %p828_p5, %p822_p6 }
  0x48   : > { %832 = shalt.err (!%p829_p4)
}
  0x49   : > { %712 = dma.hbm_to_vmem [thread:$0]  (!%p1030_p0), %s1072_s23, 512, %s1082_s7, %s184_s6, %s922_s11, %s922_s11, %s923_s19  }
  0x4a   : > { %216 = sbr.rel (%p1076_p12) target bundleno = 647 (0x287), region = 32  ;;  %s1116_s8 = sand.u32 (!%p1076_p12), 1, %s903_s13  }
  0x4b   : > { %s690_s18 = sshll.u32 (!%p1076_p12), %s1116_s8, 5  ;;  %s219_s21 = scalar_lea.sflag (!%p1076_p12), [#allocation4], %s1116_s8 }
  0x4c   : > { %s222_s9 = scalar_lea.vmem (!%p1076_p12), [#allocation3], %s690_s18  ;;  %p1268_p8 = scmp.ne.s32.totalorder (!%p1076_p12), %s1262_s24, 0 }
  0x51   : > { %886 = dma.done.wait (%p1268_p8), %s219_s21, 512  }
  0x52   : > { %888 = vsyncadd (%p1268_p8), %s219_s21, 4294966784  ;;  %s228_s28 = scalar_lea.sflag [#allocation7], %s1116_s8  ;;  %s231_s11 = scalar_lea.vmem [#allocation6], %s690_s18 }
  0x53   : > { %890 = dma.done.wait (%p1268_p8), %s228_s28, 512  }
  0x54   : > { %892 = vsyncadd (%p1268_p8), %s228_s28, 4294966784  ;;  %vm274_vm0 = vcmask 7168   ;;  %v925_v0 = vmov 0.0   ;;  %v277_v1 = vld [vmem:[%s222_s9] sm:$0xff]  ;;  %v278_v2 = vld [vmem:[%s222_s9 + $0x8] sm:$0xff]  ;;  %v926_v19 = vmov 0   ;;  %v315_v36 = vlaneseq }
  0x55   : > { %275 = vst.msk [vmem:[#allocation2] sm:$0xff] %vm274_vm0, %v925_v0  ;;  %276 = vst.msk [vmem:[#allocation2 + $0x8] sm:$0xff] %vm274_vm0, %v925_v0  ;;  %v281_v3 = vld [vmem:[%s231_s11] sm:$0xff]  ;;  %v282_v4 = vld [vmem:[%s231_s11 + $0x8] sm:$0xff]  ;;  %771 = vset.pattern.permute.xlu1 %v926_v19  ;;  %772 = vset.pattern.permute.xlu0 %v926_v19  ;;  %p265_p0 = scmp.lt.s32.totalorder %s911_s15, 1  ;;  %s262_s6 = scalar_lea.vmem [#allocation8], %s1116_s8 }
  0x56   : > { %v285_v5 = vsub.f32 %v277_v1, %v281_v3  ;;  %v279_v6 = vld [vmem:[%s222_s9 + $0x10] sm:$0xff]  ;;  %v280_v7 = vld [vmem:[%s222_s9 + $0x18] sm:$0xff]  ;;  %v286_v8 = vsub.f32 %v278_v2, %v282_v4  ;;  %v1140_v39 = vshrl.u32 %v315_v36, 7  ;;  %s564_s22 = sshll.u32 %s262_s6, 4  ;;  %s694_s29 = sshll.u32 %s911_s15, 4  ;;  %s1203_s22 = int_to_ptr.vmem [resolvable:$true] %s564_s22 }
  0x57   : > { %v283_v9 = vld [vmem:[%s231_s11 + $0x10] sm:$0xff]  ;;  %v284_v10 = vld [vmem:[%s231_s11 + $0x18] sm:$0xff]  ;;  %s266_s24 = scalar_select %p265_p0, %s911_s15, 1 }
  0x58   : > { %v291_v11 = vmul.f32 %v285_v5, %v285_v5  ;;  %v287_v12 = vsub.f32 %v279_v6, %v283_v9  ;;  %v288_v13 = vsub.f32 %v280_v7, %v284_v10  ;;  %v292_v14 = vmul.f32 %v286_v8, %v286_v8  ;;  %s1208_s10 = scalar_lea.hbm %s1258_s3, %s694_s29  ;;  %s552_s18 = scalar_lea.sflag [#allocation5], %s1116_s8 }
  0x59   : > { %s699_s19 = sshll.u32 %s266_s24, 4  ;;  %v1143_v42 = vadd.s32 8, %v1140_v39  ;;  %s833_s21 = scalar_lea.vmem %s1203_s22, 16 }
  0x5a   : > { %v293_v15 = vmul.f32 %v287_v12, %v287_v12  ;;  %v294_v16 = vmul.f32 %v288_v13, %v288_v13  ;;  %v295_v17 = vadd.f32 %v292_v14, %v291_v11  ;;  %s269_s7 = scalar_lea.vmem %s1257_s2, %s699_s19  ;;  %p834_p3 = scmp.ne.s32.totalorder %s1203_s22, %s833_s21 }
  0x5b   : > { %v311_v27 = vld [vmem:[%s269_s7] sm:$0xff]  ;;  %v312_v28 = vld [vmem:[%s269_s7 + $0x8] sm:$0xff]  ;;  %p1269_p12 = scmp.ne.s32.totalorder %s1263_s25, 0  ;;  %s927_s9 = smov [#allocation8]  }
  0x5c   : > { %296 = vadd.xlane.f32.xlu0 %v295_v17  ;;  %v298_v18 = vadd.f32 %v294_v16, %v293_v15  ;;  %v289_v20 = vld [vmem:[#allocation2] sm:$0xff]  ;;  %v290_v23 = vld [vmem:[#allocation2 + $0x8] sm:$0xff]  ;;  %s837_s15 = sshll.u32 %s927_s9, 4  ;;  %s838_s15 = int_to_ptr.vmem [resolvable:$false] %s837_s15 }
  0x5d   : > { %p835_p13 = pnand %p834_p3, %p1269_p12  ;;  %s839_s28 = scalar_lea.vmem %s838_s15, 32 }
  0x5e   : > { %p840_p10 = scmp.lt.s32.totalorder %s1203_s22, %s838_s15  ;;  %p841_p9 = scmp.lt.s32.totalorder %s839_s28, %s833_s21 }
  0x5f   : > { %p836_p7 = pneg %p835_p13 }
  0x60   : > { %299 = vadd.xlane.f32.xlu0 %v298_v18  ;;  %p842_p11 = por %p841_p9, %p840_p10 }
  0x62   : > { %p843_p1 = pnand %p842_p11, %p836_p7 }
  0xe9   : > { %v297_v21 = vpop.xlane.xlu0 %296 }
  0xea   : > { %v301_v22 = vadd.f32 %v297_v21, %v289_v20 }
  0xec   : > { %304 = vst.msk [vmem:[#allocation2] sm:$0xff] %vm274_vm0, %v301_v22 }
  0xed   : > { %v300_v24 = vpop.xlane.xlu0 %299 }
  0xee   : > { %v302_v25 = vadd.f32 %v300_v24, %v290_v23 }
  0xf0   : > { %305 = vst.msk [vmem:[#allocation2 + $0x8] sm:$0xff] %vm274_vm0, %v302_v25 }
  0xf3   : > { %v309_v26 = vld [vmem:[#allocation2] sm:$0xff] }
  0xf4   : > { %v313_v29 = vmul.f32 %v311_v27, %v309_v26 }
  0xf6   : > { %v318_v32 = vsel %vm274_vm0, %v313_v29, -inf }
  0xf7   : > { %v310_v30 = vld [vmem:[#allocation2 + $0x8] sm:$0xff] }
  0xf8   : > { %v314_v31 = vmul.f32 %v312_v28, %v310_v30 }
  0xfa   : > { %v319_v33 = vsel %vm274_vm0, %v314_v31, -inf }
  0xfb   : > { %v320_v34 = vmax.f32 %v318_v32, %v319_v33 }
  0xfd   : > { %v321_v35 = vrot.slane %v320_v34, 4 }
  0xff   : > { %v322_v37 = vmax.f32 %v320_v34, %v321_v35 }
 0x101   : > { %v323_v38 = vrot.slane %v322_v37, 2 }
 0x103   : > { %v324_v40 = vmax.f32 %v322_v37, %v323_v38 }
 0x105   : > { %v325_v41 = vrot.slane %v324_v40, 1 }
 0x107   : > { %v326_v43 = vmax.f32 %v324_v40, %v325_v41 }
 0x109   : > { %vm327_vm1 = vcmp.eq.f32.partialorder %v313_v29, %v326_v43  ;;  %vm328_vm2 = vcmp.eq.f32.partialorder %v314_v31, %v326_v43 }
 0x10a   : > { %v329_v44 = vsel %vm327_vm1, %v1140_v39, 16  ;;  %v330_v45 = vsel %vm328_vm2, %v1143_v42, 16 }
 0x10b   : > { %v331_v46 = vsel %vm274_vm0, %v329_v44, 2147483647  ;;  %v332_v47 = vsel %vm274_vm0, %v330_v45, 2147483647 }
 0x10c   : > { %vm333_vm3 = vcmp.lt.s32.totalorder %v331_v46, %v332_v47 }
 0x10d   : > { %v334_v48 = vsel %vm333_vm3, %v331_v46, %v332_v47 }
 0x10e   : > { %v335_v49 = vrot.slane %v334_v48, 4 }
 0x110   : > { %vm336_vm4 = vcmp.lt.s32.totalorder %v334_v48, %v335_v49 }
 0x111   : > { %v337_v50 = vsel %vm336_vm4, %v334_v48, %v335_v49 }
 0x112   : > { %v338_v51 = vrot.slane %v337_v50, 2 }
 0x114   : > { %vm339_vm5 = vcmp.lt.s32.totalorder %v337_v50, %v338_v51 }
 0x115   : > { %v340_v52 = vsel %vm339_vm5, %v337_v50, %v338_v51 }
 0x116   : > { %v341_v53 = vrot.slane %v340_v52, 1 }
 0x118   : > { %vm342_vm6 = vcmp.lt.s32.totalorder %v340_v52, %v341_v53 }
 0x119   : > { %v343_v54 = vsel %vm342_vm6, %v340_v52, %v341_v53 }
 0x11a   : > { %vm344_vm7 = vcmp.eq.s32.totalorder %v1140_v39, %v343_v54  ;;  %vm345_vm8 = vcmp.eq.s32.totalorder %v1143_v42, %v343_v54 }
 0x11b   : > { %v346_v55 = vsel %vm344_vm7, -inf, %v313_v29  ;;  %v347_v56 = vsel %vm345_vm8, -inf, %v314_v31 }
 0x11c   : > { %v349_v57 = vsel %vm274_vm0, %v346_v55, -inf  ;;  %v350_v58 = vsel %vm274_vm0, %v347_v56, -inf }
 0x11d   : > { %v351_v59 = vmax.f32 %v349_v57, %v350_v58 }
 0x11f   : > { %v352_v60 = vrot.slane %v351_v59, 4 }
 0x121   : > { %v353_v61 = vmax.f32 %v351_v59, %v352_v60 }
 0x123   : > { %v354_v62 = vrot.slane %v353_v61, 2 }
 0x125   : > { %v355_v63 = vmax.f32 %v353_v61, %v354_v62 }
 0x127   : > { %v356_v0 = vrot.slane %v355_v63, 1 }
 0x129   : > { %v357_v1 = vmax.f32 %v355_v63, %v356_v0 }
 0x12b   : > { %vm358_vm9 = vcmp.eq.f32.partialorder %v346_v55, %v357_v1  ;;  %vm359_vm10 = vcmp.eq.f32.partialorder %v347_v56, %v357_v1  ;;  %v379_v2 = vadd.f32 %v357_v1, %v326_v43 }
 0x12c   : > { %v360_v3 = vsel %vm358_vm9, %v1140_v39, 16  ;;  %v361_v4 = vsel %vm359_vm10, %v1143_v42, 16 }
 0x12d   : > { %v362_v5 = vsel %vm274_vm0, %v360_v3, 2147483647  ;;  %v363_v6 = vsel %vm274_vm0, %v361_v4, 2147483647 }
 0x12e   : > { %vm364_vm11 = vcmp.lt.s32.totalorder %v362_v5, %v363_v6 }
 0x12f   : > { %v365_v7 = vsel %vm364_vm11, %v362_v5, %v363_v6 }
 0x130   : > { %v366_v8 = vrot.slane %v365_v7, 4 }
 0x132   : > { %vm367_vm12 = vcmp.lt.s32.totalorder %v365_v7, %v366_v8 }
 0x133   : > { %v368_v9 = vsel %vm367_vm12, %v365_v7, %v366_v8 }
 0x134   : > { %v369_v10 = vrot.slane %v368_v9, 2 }
 0x136   : > { %vm370_vm13 = vcmp.lt.s32.totalorder %v368_v9, %v369_v10 }
 0x137   : > { %v371_v11 = vsel %vm370_vm13, %v368_v9, %v369_v10 }
 0x138   : > { %v372_v12 = vrot.slane %v371_v11, 1 }
 0x13a   : > { %vm373_vm14 = vcmp.lt.s32.totalorder %v371_v11, %v372_v12 }
 0x13b   : > { %v374_v13 = vsel %vm373_vm14, %v371_v11, %v372_v12 }
 0x13c   : > { %vm375_vm15 = vcmp.eq.s32.totalorder %v1140_v39, %v374_v13  ;;  %vm376_vm1 = vcmp.eq.s32.totalorder %v1143_v42, %v374_v13 }
 0x13d   : > { %v377_v14 = vsel %vm375_vm15, -inf, %v346_v55  ;;  %v378_v15 = vsel %vm376_vm1, -inf, %v347_v56 }
 0x13e   : > { %v380_v16 = vsel %vm274_vm0, %v377_v14, -inf  ;;  %v381_v17 = vsel %vm274_vm0, %v378_v15, -inf }
 0x13f   : > { %v382_v18 = vmax.f32 %v380_v16, %v381_v17 }
 0x141   : > { %v383_v19 = vrot.slane %v382_v18, 4 }
 0x143   : > { %v384_v20 = vmax.f32 %v382_v18, %v383_v19 }
 0x145   : > { %v385_v21 = vrot.slane %v384_v20, 2 }
 0x147   : > { %v386_v22 = vmax.f32 %v384_v20, %v385_v21 }
 0x149   : > { %v387_v23 = vrot.slane %v386_v22, 1 }
 0x14b   : > { %v388_v24 = vmax.f32 %v386_v22, %v387_v23 }
 0x14d   : > { %vm389_vm2 = vcmp.eq.f32.partialorder %v377_v14, %v388_v24  ;;  %vm390_vm3 = vcmp.eq.f32.partialorder %v378_v15, %v388_v24  ;;  %v410_v25 = vadd.f32 %v388_v24, %v379_v2 }
 0x14e   : > { %v391_v26 = vsel %vm389_vm2, %v1140_v39, 16  ;;  %v392_v27 = vsel %vm390_vm3, %v1143_v42, 16 }
 0x14f   : > { %v393_v28 = vsel %vm274_vm0, %v391_v26, 2147483647  ;;  %v394_v29 = vsel %vm274_vm0, %v392_v27, 2147483647 }
 0x150   : > { %vm395_vm4 = vcmp.lt.s32.totalorder %v393_v28, %v394_v29 }
 0x151   : > { %v396_v30 = vsel %vm395_vm4, %v393_v28, %v394_v29 }
 0x152   : > { %v397_v31 = vrot.slane %v396_v30, 4 }
 0x154   : > { %vm398_vm5 = vcmp.lt.s32.totalorder %v396_v30, %v397_v31 }
 0x155   : > { %v399_v32 = vsel %vm398_vm5, %v396_v30, %v397_v31 }
 0x156   : > { %v400_v33 = vrot.slane %v399_v32, 2 }
 0x158   : > { %vm401_vm6 = vcmp.lt.s32.totalorder %v399_v32, %v400_v33 }
 0x159   : > { %v402_v34 = vsel %vm401_vm6, %v399_v32, %v400_v33 }
 0x15a   : > { %v403_v35 = vrot.slane %v402_v34, 1 }
 0x15c   : > { %vm404_vm7 = vcmp.lt.s32.totalorder %v402_v34, %v403_v35 }
 0x15d   : > { %v405_v36 = vsel %vm404_vm7, %v402_v34, %v403_v35 }
 0x15e   : > { %vm406_vm8 = vcmp.eq.s32.totalorder %v1140_v39, %v405_v36  ;;  %vm407_vm9 = vcmp.eq.s32.totalorder %v1143_v42, %v405_v36 }
 0x15f   : > { %v408_v37 = vsel %vm406_vm8, -inf, %v377_v14  ;;  %v409_v38 = vsel %vm407_vm9, -inf, %v378_v15 }
 0x160   : > { %v411_v40 = vsel %vm274_vm0, %v408_v37, -inf  ;;  %v412_v41 = vsel %vm274_vm0, %v409_v38, -inf }
 0x161   : > { %v413_v43 = vmax.f32 %v411_v40, %v412_v41 }
 0x163   : > { %v414_v44 = vrot.slane %v413_v43, 4 }
 0x165   : > { %v415_v45 = vmax.f32 %v413_v43, %v414_v44 }
 0x167   : > { %v416_v46 = vrot.slane %v415_v45, 2 }
 0x169   : > { %v417_v47 = vmax.f32 %v415_v45, %v416_v46 }
 0x16b   : > { %v418_v48 = vrot.slane %v417_v47, 1 }
 0x16d   : > { %v419_v49 = vmax.f32 %v417_v47, %v418_v48 }
 0x16f   : > { %vm420_vm10 = vcmp.eq.f32.partialorder %v408_v37, %v419_v49  ;;  %vm421_vm11 = vcmp.eq.f32.partialorder %v409_v38, %v419_v49  ;;  %v441_v50 = vadd.f32 %v419_v49, %v410_v25 }
 0x170   : > { %v422_v51 = vsel %vm420_vm10, %v1140_v39, 16  ;;  %v423_v52 = vsel %vm421_vm11, %v1143_v42, 16 }
 0x171   : > { %v424_v53 = vsel %vm274_vm0, %v422_v51, 2147483647  ;;  %v425_v54 = vsel %vm274_vm0, %v423_v52, 2147483647 }
 0x172   : > { %vm426_vm12 = vcmp.lt.s32.totalorder %v424_v53, %v425_v54 }
 0x173   : > { %v427_v55 = vsel %vm426_vm12, %v424_v53, %v425_v54 }
 0x174   : > { %v428_v56 = vrot.slane %v427_v55, 4 }
 0x176   : > { %vm429_vm13 = vcmp.lt.s32.totalorder %v427_v55, %v428_v56 }
 0x177   : > { %v430_v57 = vsel %vm429_vm13, %v427_v55, %v428_v56 }
 0x178   : > { %v431_v58 = vrot.slane %v430_v57, 2 }
 0x17a   : > { %vm432_vm14 = vcmp.lt.s32.totalorder %v430_v57, %v431_v58 }
 0x17b   : > { %v433_v59 = vsel %vm432_vm14, %v430_v57, %v431_v58 }
 0x17c   : > { %v434_v60 = vrot.slane %v433_v59, 1 }
 0x17e   : > { %vm435_vm15 = vcmp.lt.s32.totalorder %v433_v59, %v434_v60 }
 0x17f   : > { %v436_v61 = vsel %vm435_vm15, %v433_v59, %v434_v60 }
 0x180   : > { %vm437_vm1 = vcmp.eq.s32.totalorder %v1140_v39, %v436_v61  ;;  %vm438_vm2 = vcmp.eq.s32.totalorder %v1143_v42, %v436_v61 }
 0x181   : > { %v439_v62 = vsel %vm437_vm1, -inf, %v408_v37  ;;  %v440_v63 = vsel %vm438_vm2, -inf, %v409_v38 }
 0x182   : > { %v442_v0 = vsel %vm274_vm0, %v439_v62, -inf  ;;  %v443_v1 = vsel %vm274_vm0, %v440_v63, -inf }
 0x183   : > { %v444_v2 = vmax.f32 %v442_v0, %v443_v1 }
 0x185   : > { %v445_v3 = vrot.slane %v444_v2, 4 }
 0x187   : > { %v446_v4 = vmax.f32 %v444_v2, %v445_v3 }
 0x189   : > { %v447_v5 = vrot.slane %v446_v4, 2 }
 0x18b   : > { %v448_v6 = vmax.f32 %v446_v4, %v447_v5 }
 0x18d   : > { %v449_v7 = vrot.slane %v448_v6, 1 }
 0x18f   : > { %v450_v8 = vmax.f32 %v448_v6, %v449_v7 }
 0x191   : > { %vm451_vm3 = vcmp.eq.f32.partialorder %v439_v62, %v450_v8  ;;  %vm452_vm4 = vcmp.eq.f32.partialorder %v440_v63, %v450_v8  ;;  %v472_v9 = vadd.f32 %v450_v8, %v441_v50 }
 0x192   : > { %v453_v10 = vsel %vm451_vm3, %v1140_v39, 16  ;;  %v454_v11 = vsel %vm452_vm4, %v1143_v42, 16 }
 0x193   : > { %v455_v12 = vsel %vm274_vm0, %v453_v10, 2147483647  ;;  %v456_v13 = vsel %vm274_vm0, %v454_v11, 2147483647 }
 0x194   : > { %vm457_vm5 = vcmp.lt.s32.totalorder %v455_v12, %v456_v13 }
 0x195   : > { %v458_v14 = vsel %vm457_vm5, %v455_v12, %v456_v13 }
 0x196   : > { %v459_v15 = vrot.slane %v458_v14, 4 }
 0x198   : > { %vm460_vm6 = vcmp.lt.s32.totalorder %v458_v14, %v459_v15 }
 0x199   : > { %v461_v16 = vsel %vm460_vm6, %v458_v14, %v459_v15 }
 0x19a   : > { %v462_v17 = vrot.slane %v461_v16, 2 }
 0x19c   : > { %vm463_vm7 = vcmp.lt.s32.totalorder %v461_v16, %v462_v17 }
 0x19d   : > { %v464_v18 = vsel %vm463_vm7, %v461_v16, %v462_v17 }
 0x19e   : > { %v465_v19 = vrot.slane %v464_v18, 1 }
 0x1a0   : > { %vm466_vm8 = vcmp.lt.s32.totalorder %v464_v18, %v465_v19 }
 0x1a1   : > { %v467_v20 = vsel %vm466_vm8, %v464_v18, %v465_v19 }
 0x1a2   : > { %vm468_vm9 = vcmp.eq.s32.totalorder %v1140_v39, %v467_v20  ;;  %vm469_vm10 = vcmp.eq.s32.totalorder %v1143_v42, %v467_v20 }
 0x1a3   : > { %v470_v21 = vsel %vm468_vm9, -inf, %v439_v62  ;;  %v471_v22 = vsel %vm469_vm10, -inf, %v440_v63 }
 0x1a4   : > { %v473_v23 = vsel %vm274_vm0, %v470_v21, -inf  ;;  %v474_v24 = vsel %vm274_vm0, %v471_v22, -inf }
 0x1a5   : > { %v475_v25 = vmax.f32 %v473_v23, %v474_v24 }
 0x1a7   : > { %v476_v26 = vrot.slane %v475_v25, 4 }
 0x1a9   : > { %v477_v27 = vmax.f32 %v475_v25, %v476_v26 }
 0x1ab   : > { %v478_v28 = vrot.slane %v477_v27, 2 }
 0x1ad   : > { %v479_v29 = vmax.f32 %v477_v27, %v478_v28 }
 0x1af   : > { %v480_v30 = vrot.slane %v479_v29, 1 }
 0x1b1   : > { %v481_v31 = vmax.f32 %v479_v29, %v480_v30 }
 0x1b3   : > { %vm482_vm11 = vcmp.eq.f32.partialorder %v470_v21, %v481_v31  ;;  %vm483_vm12 = vcmp.eq.f32.partialorder %v471_v22, %v481_v31  ;;  %v503_v32 = vadd.f32 %v481_v31, %v472_v9 }
 0x1b4   : > { %v484_v33 = vsel %vm482_vm11, %v1140_v39, 16  ;;  %v485_v34 = vsel %vm483_vm12, %v1143_v42, 16 }
 0x1b5   : > { %v486_v35 = vsel %vm274_vm0, %v484_v33, 2147483647  ;;  %v487_v36 = vsel %vm274_vm0, %v485_v34, 2147483647 }
 0x1b6   : > { %vm488_vm13 = vcmp.lt.s32.totalorder %v486_v35, %v487_v36 }
 0x1b7   : > { %v489_v37 = vsel %vm488_vm13, %v486_v35, %v487_v36 }
 0x1b8   : > { %v490_v38 = vrot.slane %v489_v37, 4 }
 0x1ba   : > { %vm491_vm14 = vcmp.lt.s32.totalorder %v489_v37, %v490_v38 }
 0x1bb   : > { %v492_v40 = vsel %vm491_vm14, %v489_v37, %v490_v38 }
 0x1bc   : > { %v493_v41 = vrot.slane %v492_v40, 2 }
 0x1be   : > { %vm494_vm15 = vcmp.lt.s32.totalorder %v492_v40, %v493_v41 }
 0x1bf   : > { %v495_v43 = vsel %vm494_vm15, %v492_v40, %v493_v41 }
 0x1c0   : > { %v496_v44 = vrot.slane %v495_v43, 1 }
 0x1c2   : > { %vm497_vm1 = vcmp.lt.s32.totalorder %v495_v43, %v496_v44 }
 0x1c3   : > { %v498_v45 = vsel %vm497_vm1, %v495_v43, %v496_v44 }
 0x1c4   : > { %vm499_vm2 = vcmp.eq.s32.totalorder %v1140_v39, %v498_v45  ;;  %vm500_vm3 = vcmp.eq.s32.totalorder %v1143_v42, %v498_v45 }
 0x1c5   : > { %v501_v46 = vsel %vm499_vm2, -inf, %v470_v21  ;;  %v502_v47 = vsel %vm500_vm3, -inf, %v471_v22 }
 0x1c6   : > { %v504_v48 = vsel %vm274_vm0, %v501_v46, -inf  ;;  %v505_v49 = vsel %vm274_vm0, %v502_v47, -inf }
 0x1c7   : > { %v506_v50 = vmax.f32 %v504_v48, %v505_v49 }
 0x1c9   : > { %v507_v51 = vrot.slane %v506_v50, 4 }
 0x1cb   : > { %v508_v52 = vmax.f32 %v506_v50, %v507_v51 }
 0x1cd   : > { %v509_v53 = vrot.slane %v508_v52, 2 }
 0x1cf   : > { %v510_v54 = vmax.f32 %v508_v52, %v509_v53 }
 0x1d1   : > { %v511_v55 = vrot.slane %v510_v54, 1 }
 0x1d3   : > { %v512_v56 = vmax.f32 %v510_v54, %v511_v55 }
 0x1d5   : > { %vm513_vm4 = vcmp.eq.f32.partialorder %v501_v46, %v512_v56  ;;  %vm514_vm5 = vcmp.eq.f32.partialorder %v502_v47, %v512_v56  ;;  %v534_v14 = vadd.f32 %v512_v56, %v503_v32 }
 0x1d6   : > { %v515_v57 = vsel %vm513_vm4, %v1140_v39, 16  ;;  %v516_v58 = vsel %vm514_vm5, %v1143_v42, 16 }
 0x1d7   : > { %v517_v59 = vsel %vm274_vm0, %v515_v57, 2147483647  ;;  %v518_v60 = vsel %vm274_vm0, %v516_v58, 2147483647 }
 0x1d8   : > { %vm519_vm6 = vcmp.lt.s32.totalorder %v517_v59, %v518_v60 }
 0x1d9   : > { %v520_v61 = vsel %vm519_vm6, %v517_v59, %v518_v60 }
 0x1da   : > { %v521_v62 = vrot.slane %v520_v61, 4 }
 0x1dc   : > { %vm522_vm7 = vcmp.lt.s32.totalorder %v520_v61, %v521_v62 }
 0x1dd   : > { %v523_v63 = vsel %vm522_vm7, %v520_v61, %v521_v62 }
 0x1de   : > { %v524_v0 = vrot.slane %v523_v63, 2 }
 0x1e0   : > { %vm525_vm8 = vcmp.lt.s32.totalorder %v523_v63, %v524_v0 }
 0x1e1   : > { %v526_v1 = vsel %vm525_vm8, %v523_v63, %v524_v0 }
 0x1e2   : > { %v527_v2 = vrot.slane %v526_v1, 1 }
 0x1e4   : > { %vm528_vm9 = vcmp.lt.s32.totalorder %v526_v1, %v527_v2 }
 0x1e5   : > { %v529_v3 = vsel %vm528_vm9, %v526_v1, %v527_v2 }
 0x1e6   : > { %vm530_vm10 = vcmp.eq.s32.totalorder %v1140_v39, %v529_v3  ;;  %vm531_vm11 = vcmp.eq.s32.totalorder %v1143_v42, %v529_v3 }
 0x1e7   : > { %v532_v4 = vsel %vm530_vm10, -inf, %v501_v46  ;;  %v533_v5 = vsel %vm531_vm11, -inf, %v502_v47 }
 0x1e8   : > { %v535_v6 = vsel %vm274_vm0, %v532_v4, -inf  ;;  %v536_v7 = vsel %vm274_vm0, %v533_v5, -inf }
 0x1e9   : > { %v537_v8 = vmax.f32 %v535_v6, %v536_v7 }
 0x1eb   : > { %v538_v9 = vrot.slane %v537_v8, 4 }
 0x1ed   : > { %v539_v10 = vmax.f32 %v537_v8, %v538_v9 }
 0x1ef   : > { %v540_v11 = vrot.slane %v539_v10, 2 }
 0x1f1   : > { %v541_v12 = vmax.f32 %v539_v10, %v540_v11 }
 0x1f3   : > { %v542_v13 = vrot.slane %v541_v12, 1 }
 0x1f5   : > { %v543_v39 = vmax.f32 %v541_v12, %v542_v13 }
 0x1f7   : > { %v544_v15 = vadd.f32 %v543_v39, %v534_v14 }
 0x1f9   : > { %547 = vperm.xlu1 %771, %v544_v15  }
 0x278   : > { %v548_v42 = vpop.permute.xlu1 %547 }
 0x279   : > { %550 = vst [vmem:[%s262_s6] sm:$0x1] %v548_v42 }
 0x27a   : > { %846 = shalt.err (!%p843_p1)
}
 0x27b   : > { %s847_s8 = scalar_lea.hbm %s1208_s10, 16  ;;  %s851_s19 = scalar_lea.hbm %s1258_s3, 32 }
 0x27c   : > { %p848_p6 = scmp.ne.s32.totalorder %s1208_s10, %s847_s8  ;;  %p852_p4 = scmp.lt.u32.totalorder %s1208_s10, %s1258_s3 }
 0x27d   : > { %p853_p8 = scmp.lt.u32.totalorder %s851_s19, %s847_s8  ;;  %p855_p3 = scmp.lt.u32.totalorder %s847_s8, %s1208_s10 }
 0x27e   : > { %p849_p2 = pnand %p848_p6, %p1269_p12 }
 0x27f   : > { %p854_p0 = por %p853_p8, %p852_p4 }
 0x280   : > { %p850_p5 = pneg %p849_p2 }
 0x281   : > { %p856_p13 = por %p855_p3, %p854_p0 }
 0x283   : > { %p857_p7 = pnand %p856_p13, %p850_p5 }
 0x285   : > { %860 = shalt.err (!%p857_p7)
}
 0x286   : > { %704 = dma.vmem_to_hbm [thread:$0]  (%p1269_p12), %s1203_s22, 16, %s1208_s10, %s552_s18  }
 0x287 PF: > { %s576_s7 = sand.u32 1, %s899_s12   ;;  %p1270_p10 = scmp.ne.s32.totalorder %s1264_s27, 0 }
 0x288   : > { %p1271_p9 = scmp.ge.s32.totalorder %s919_s17, 2  ;;  %s577_s6 = scalar_lea.sflag [#allocation5], %s576_s7 }
 0x28a   : > { %p714_p11 = pnand %p1271_p9, %p1270_p10 }
 0x28c   : > { %894 = dma.done.wait (!%p714_p11), %s577_s6, 16  }
 0x28d   : > { %896 = vsyncadd (!%p714_p11), %s577_s6, 4294967280  ;;  %s22_s17 = sadd.s32 1, %s919_s17   ;;  %s1272_s12 = smov %s903_s13 }
 0x28e   : > { %p19_p1 = scmp.ge.s32.totalorder %s22_s17, 4   ;;  %s1273_s13 = smov %s907_s14 }
 0x28f   : > { %s1274_s14 = smov %s1004_s26  ;;  %s1275_s15 = smov %s915_s16 }
 0x290   : > { %s1276_s16 = smov %s1278_s20  ;;  %21 = sbr.rel (!%p19_p1) target bundleno = 8 (0x8), region = 101 }
 0x297   :  { %581 = vsyncpa [#allocation4], 1 }
 0x298   :  { %583 = vsyncpa [#allocation4 + $0x1], 1 }
 0x299   :  { %584 = vsyncpa [#allocation7], 1 }
 0x29a   :  { %586 = vsyncpa [#allocation7 + $0x1], 1 }
 0x29b   :  { %587 = vsyncpa [#allocation5], 1 }
 0x29c   :  { %589 = vsyncpa [#allocation5 + $0x1], 1 }

</bundles_post_ra>
